<compile_context>
chip_gen: v7x
topology: tpu7x:2x2x1
jax: 0.10.0
libtpu: 0.0.40
codegen_flags: <defaults>
</compile_context>

<pallas_src>
import functools

import jax
import jax.numpy as jnp
from jax.experimental import pallas as pl
from jax.experimental.pallas import tpu as pltpu

_VMEM_LIMIT = 64 * 1024 * 1024  # explicit scoped-VMEM budget (fits all gens)


def _choose_tile(n: int, target: int) -> int:
    """Largest divisor of n <= target, preferring 256/128/8 alignment."""
    if n <= target:
        return n
    for align in (256, 128, 8):
        t = (target // align) * align
        while t >= align:
            if n % t == 0:
                return t
            t -= align
    # TODO(synk): for long, oddly-sized N, pad on the host and mask the tail
    # tile instead of falling back to a whole-sequence block.
    return n


# ---------------------------------------------------------------------------
# Kernel A: fused qkv projection (bf16 MXU operands, f32 accumulate),
# single lane-dense (ts, 3C) bf16 store.
# ---------------------------------------------------------------------------
def _qkv_proj_kernel(x_ref, w_ref, qkv_ref):
    qkv = jnp.dot(x_ref[0], w_ref[...], preferred_element_type=jnp.float32)
    qkv_ref[0] = qkv.astype(qkv_ref.dtype)


# ---------------------------------------------------------------------------
# Kernel B: flash-style attention over kv tiles + fused output projection.
# ---------------------------------------------------------------------------
def _flash_attn_proj_kernel(q_ref, k_ref, v_ref, wproj_ref, bproj_ref, o_ref,
                            m_sc, l_sc, acc_sc, *, num_heads: int,
                            lane_aligned_heads: bool):
    kv = pl.program_id(2)

    @pl.when(kv == 0)
    def _init():
        m_sc[...] = jnp.full(m_sc.shape, -jnp.inf, dtype=m_sc.dtype)
        l_sc[...] = jnp.zeros(l_sc.shape, dtype=l_sc.dtype)
        acc_sc[...] = jnp.zeros(acc_sc.shape, dtype=acc_sc.dtype)

    # q/k/v already arrive as bf16 (no per-step casts).
    q = q_ref[0]                                         # (H, tq, d) bf16
    k = k_ref[0]                                         # (H, tk, d) bf16
    v = v_ref[0]                                         # (H, tk, d) bf16

    # Scores for all heads in one batched MXU op (scale pre-folded into Wq).
    s = jnp.einsum('hqd,hkd->hqk', q, k,
                   preferred_element_type=jnp.float32)   # (H, tq, tk) f32

    m_prev = m_sc[...]
    m_new = jnp.maximum(m_prev, jnp.max(s, axis=-1, keepdims=True))
    alpha = jnp.exp(m_prev - m_new)
    p = jnp.exp(s - m_new)                               # f32 softmax math
    l_sc[...] = alpha * l_sc[...] + jnp.sum(p, axis=-1, keepdims=True)
    acc_sc[...] = alpha * acc_sc[...] + jnp.einsum(
        'hqk,hkd->hqd', p.astype(jnp.bfloat16), v,
        preferred_element_type=jnp.float32)              # (H, tq, d) f32
    m_sc[...] = m_new

    @pl.when(kv == pl.num_programs(2) - 1)
    def _finalize():
        # Normalize once on the (H, tq, d) accumulator (EUP reciprocal).
        ctx = (acc_sc[...] * pl.reciprocal(l_sc[...], approx=True)
               ).astype(jnp.bfloat16)
        if lane_aligned_heads:
            # head_dim % 128 == 0: lane-aligned head merge -> one full-depth
            # (K = C) projection matmul against the resident (C, C) weight.
            ctx2d = jnp.concatenate([ctx[h] for h in range(num_heads)],
                                    axis=-1)             # (tq, C) bf16
            y = jnp.dot(ctx2d, wproj_ref[...],
                        preferred_element_type=jnp.float32)
        else:
            # Small / unaligned head_dim: per-head K=d matmuls (safe lowering;
            # wproj is passed as (H, d, C)).
            y = jnp.dot(ctx[0], wproj_ref[0],
                        preferred_element_type=jnp.float32)
            for h in range(1, num_heads):
                y = y + jnp.dot(ctx[h], wproj_ref[h],
                                preferred_element_type=jnp.float32)
        o_ref[0] = (y + bproj_ref[...]).astype(o_ref.dtype)


def self_attn(x, w_qkv, w_proj, b_proj, *, num_heads: int,
              q_tile: int = 512, kv_tile: int = 256):
    """x: (B, N, C). w_qkv: (C, 3C). w_proj: (C, C). b_proj: (C,)."""
    B, N, C = x.shape
    assert C % num_heads == 0
    d = C // num_heads
    scale = d ** (-0.5)
    lane_aligned = (d % 128 == 0)

    # Host-side prep: fold the softmax scale into the Q columns of the fused
    # qkv weight, cast weights/activations to bf16 (halves DMA + VMEM).
    w_fused = jnp.concatenate([w_qkv[:, :C] * scale, w_qkv[:, C:]],
                              axis=1).astype(jnp.bfloat16)          # (C, 3C)
    if lane_aligned:
        w_o = w_proj.astype(jnp.bfloat16)                            # (C, C)
        wproj_spec = pl.BlockSpec((C, C), lambda b, i, j: (0, 0))
    else:
        w_o = w_proj.reshape(num_heads, d, C).astype(jnp.bfloat16)   # (H, d, C)
        wproj_spec = pl.BlockSpec((num_heads, d, C),
                                  lambda b, i, j: (0, 0, 0))
    b_o = b_proj.reshape(1, C).astype(jnp.float32)
    x_bf = x.astype(jnp.bfloat16)

    # ---- Kernel A: fused qkv projection ------------------------------------
    ts = _choose_tile(N, max(q_tile, kv_tile))
    qkv = pl.pallas_call(
        _qkv_proj_kernel,
        out_shape=jax.ShapeDtypeStruct((B, N, 3 * C), jnp.bfloat16),
        grid_spec=pltpu.PrefetchScalarGridSpec(
            num_scalar_prefetch=0,
            grid=(B, N // ts),
            in_specs=[
                pl.BlockSpec((1, ts, C), lambda b, s: (b, s, 0)),    # x tile
                # Constant-index resident weight.
                # TODO(synk): on v7x / large C, single-buffer this block
                # (pipeline_mode=pl.Buffered(1)) to halve its VMEM footprint.
                pl.BlockSpec((C, 3 * C), lambda b, s: (0, 0)),
            ],
            out_specs=pl.BlockSpec((1, ts, 3 * C), lambda b, s: (b, s, 0)),
        ),
        compiler_params=pltpu.CompilerParams(
            dimension_semantics=("parallel", "parallel"),
            vmem_limit_bytes=_VMEM_LIMIT),
    )(x_bf, w_fused)

    # Head split between the kernels: O(N*C) XLA reshape/transpose keeps all
    # per-head lane slicing out of both Pallas kernels.
    q, k, v = jnp.split(qkv, 3, axis=-1)                 # each (B, N, C) bf16

    def to_heads(t):                                     # 'b n (h d) -> b h n d'
        return t.reshape(B, N, num_heads, d).transpose(0, 2, 1, 3)

    q, k, v = map(to_heads, (q, k, v))                   # (B, H, N, d) bf16

    # ---- Kernel B: flash attention + fused output projection ----------------
    tq = _choose_tile(N, q_tile)
    tk = _choose_tile(N, kv_tile)
    attn_kernel = functools.partial(_flash_attn_proj_kernel,
                                    num_heads=num_heads,
                                    lane_aligned_heads=lane_aligned)
    return pl.pallas_call(
        attn_kernel,
        out_shape=jax.ShapeDtypeStruct((B, N, C), x.dtype),
        grid_spec=pltpu.PrefetchScalarGridSpec(
            num_scalar_prefetch=0,
            grid=(B, N // tq, N // tk),
            in_specs=[
                pl.BlockSpec((1, num_heads, tq, d), lambda b, i, j: (b, 0, i, 0)),
                pl.BlockSpec((1, num_heads, tk, d), lambda b, i, j: (b, 0, j, 0)),
                pl.BlockSpec((1, num_heads, tk, d), lambda b, i, j: (b, 0, j, 0)),
                wproj_spec,                               # resident projection
                pl.BlockSpec((1, C), lambda b, i, j: (0, 0)),
            ],
            out_specs=pl.BlockSpec((1, tq, C), lambda b, i, j: (b, i, 0)),
            scratch_shapes=[
                pltpu.VMEM((num_heads, tq, 1), jnp.float32),   # running max m
                pltpu.VMEM((num_heads, tq, 1), jnp.float32),   # running sum l
                pltpu.VMEM((num_heads, tq, d), jnp.float32),   # output accumulator
            ],
        ),
        compiler_params=pltpu.CompilerParams(
            dimension_semantics=("parallel", "parallel", "arbitrary"),
            vmem_limit_bytes=_VMEM_LIMIT),
    )(q, k, v, w_o, b_o)


def self_attn_ref(x, w_qkv, w_proj, b_proj, *, num_heads: int):
    """Pure-JAX f32 reference matching the PyTorch forward exactly."""
    B, N, C = x.shape
    d = C // num_heads
    scale = d ** (-0.5)
    qkv = x @ w_qkv                                        # (B, N, 3C)
    q, k, v = jnp.split(qkv, 3, axis=-1)

    def to_heads(t):                                       # 'b n (h d) -> b h n d'
        return t.reshape(B, N, num_heads, d).transpose(0, 2, 1, 3)

    q, k, v = map(to_heads, (q, k, v))
    attn = jnp.einsum('bijc,bikc->bijk', q, k) * scale
    attn = jax.nn.softmax(attn, axis=-1)
    o = jnp.einsum('bijk,bikc->bijc', attn, v)             # (B, h, N, d)
    o = o.transpose(0, 2, 1, 3).reshape(B, N, C)           # 'b i j c -> b j (i c)'
    return o @ w_proj + b_proj


if __name__ == "__main__":
    B, N, DIM, NUM_HEADS = 2, 8, 32, 8   # head_dim = 4

    key = jax.random.PRNGKey(0)
    kx, kqkv, kw, kb = jax.random.split(key, 4)

    x = jax.random.normal(kx, (B, N, DIM), dtype=jnp.float32)

    # PyTorch Linear stores W as (out, in) and computes x @ W.T; we build the
    # already-transposed (in, out) matrices. qkv has bias=False, proj has bias.
    w_qkv = jax.random.normal(kqkv, (DIM, 3 * DIM), dtype=jnp.float32) * 0.1
    w_proj = jax.random.normal(kw, (DIM, DIM), dtype=jnp.float32) * 0.1
    b_proj = jax.random.normal(kb, (DIM,), dtype=jnp.float32) * 0.1

    out = self_attn(x, w_qkv, w_proj, b_proj, num_heads=NUM_HEADS)
    out = jax.block_until_ready(out)

    ref = self_attn_ref(x, w_qkv, w_proj, b_proj, num_heads=NUM_HEADS)
    assert out.shape == (B, N, DIM)
    # bf16 MXU operands / bf16 q,k,v intermediates with f32 accumulation =>
    # relaxed tolerance vs the f32 reference.
    assert jnp.allclose(out, ref, atol=3e-2, rtol=3e-2), "mismatch vs JAX reference"

    print("KERNEL_OK")
</pallas_src>

<mosaic_0001>
module attributes {stable_mosaic.version = 11 : i64} {
  func.func @_qkv_proj_kernel(%arg0: i32, %arg1: i32, %arg2: memref<1x8x32xbf16, #tpu.memory_space<vmem>>, %arg3: memref<32x96xbf16, #tpu.memory_space<vmem>>, %arg4: memref<1x8x96xbf16, #tpu.memory_space<vmem>>) attributes {dimension_semantics = [#tpu.dimension_semantics<parallel>, #tpu.dimension_semantics<parallel>], iteration_bounds = array<i64: 2, 1>, scalar_prefetch = 0 : i64, scratch_operands = 0 : i64, tpu.core_type = #tpu.core_type<tc>, window_params = [{transform_indices = @transform_0, window_bounds = array<i64: 1, 8, 32>}, {pipeline_mode = #tpu.pipeline_mode<synchronous>, transform_indices = @transform_1, window_bounds = array<i64: 32, 96>}, {transform_indices = @transform_2, window_bounds = array<i64: 1, 8, 96>}]} {
    %c0 = arith.constant 0 : index
    %c0_0 = arith.constant 0 : index
    %c0_1 = arith.constant 0 : index
    %0 = vector.load %arg2[%c0, %c0_0, %c0_1] : memref<1x8x32xbf16, #tpu.memory_space<vmem>>, vector<1x8x32xbf16>
    %1 = vector.shape_cast %0 : vector<1x8x32xbf16> to vector<8x32xbf16>
    %c0_2 = arith.constant 0 : index
    %c0_3 = arith.constant 0 : index
    %2 = vector.load %arg3[%c0_2, %c0_3] : memref<32x96xbf16, #tpu.memory_space<vmem>>, vector<32x96xbf16>
    %cst = arith.constant dense<0.000000e+00> : vector<8x96xf32>
    %3 = tpu.matmul %1, %2, %cst {dimension_numbers = #tpu.dot_dimension_numbers<[1], [0], [0], [1], [0, 0, 1, 1], [], []>} : vector<8x32xbf16>, vector<32x96xbf16>, vector<8x96xf32> -> vector<8x96xf32>
    %4 = arith.truncf %3 : vector<8x96xf32> to vector<8x96xbf16>
    %c0_4 = arith.constant 0 : index
    %c0_5 = arith.constant 0 : index
    %c0_6 = arith.constant 0 : index
    %5 = vector.load %arg4[%c0_4, %c0_5, %c0_6] : memref<1x8x96xbf16, #tpu.memory_space<vmem>>, vector<1x8x96xbf16>
    %6 = vector.shape_cast %5 : vector<1x8x96xbf16> to vector<8x96xbf16>
    %7 = vector.shape_cast %4 : vector<8x96xbf16> to vector<1x8x96xbf16>
    tpu.vector_store %arg4[%c0_4, %c0_5, %c0_6], %7 {strides = array<i32>} : memref<1x8x96xbf16, #tpu.memory_space<vmem>>, vector<1x8x96xbf16>,
    return
  }
  func.func @transform_0(%arg0: i32, %arg1: i32) -> (i32, i32, i32) {
    %c0_i32 = arith.constant 0 : i32
    %c0_i32_0 = arith.constant 0 : i32
    return %arg0, %arg1, %c0_i32 : i32, i32, i32
  }
  func.func @transform_1(%arg0: i32, %arg1: i32) -> (i32, i32) {
    %c0_i32 = arith.constant 0 : i32
    %c0_i32_0 = arith.constant 0 : i32
    %c0_i32_1 = arith.constant 0 : i32
    return %c0_i32, %c0_i32_0 : i32, i32
  }
  func.func @transform_2(%arg0: i32, %arg1: i32) -> (i32, i32, i32) {
    %c0_i32 = arith.constant 0 : i32
    %c0_i32_0 = arith.constant 0 : i32
    return %arg0, %arg1, %c0_i32 : i32, i32, i32
  }
}

</mosaic_0001>

<bundles_post_ra>
// kernel: tpu_custom_call.1
= control target key start
LH: loop header
LB: loop body
LE: loop exit
PB: predicated region body
PF: predicated region fallthrough
CT: control target
= control target key end

     0   :  { %7 = vsyncpa [#allocation3], 0  ;;  %s851_s0 = inlined_call_operand.hbm [shape: bf16[2,8,32], index: 0, kind: input, shape index: {}]   ;;  %s852_s1 = inlined_call_operand.hbm [shape: bf16[32,96], index: 1, kind: input, shape index: {}]   ;;  %s853_s2 = inlined_call_operand.hbm [shape: bf16[2,8,96], index: 2, kind: output, shape index: {}]  }
   0x1   :  { %9 = vsyncpa [#allocation3 + $0x1], 0 }
   0x2   :  { %10 = vsyncpa [#allocation6], 0 }
   0x3   :  { %11 = vsyncpa [#allocation4], 0 }
   0x4   :  { %13 = vsyncpa [#allocation4 + $0x1], 0  ;;  %s637_s9 = smov 0   ;;  %s639_s10 = smov 0  }
   0x5   :  { %s641_s11 = smov 0   ;;  %s643_s12 = smov 0  }
   0x6   :  { %s645_s13 = smov 0   ;;  %s647_s14 = smov 0  }
   0x7 LB: > { %s361_s15 = sadd.s32 4294967295, %s613_s14   ;;  %s362_s16 = sadd.s32 4294967294, %s613_s14   ;;  %s613_s14 = sphi %s647_s14, %s19_s14   ;;  %s609_s13 = sphi %s645_s13, %s877_s13   ;;  %s605_s12 = sphi %s643_s12, %s876_s12   ;;  %s601_s11 = sphi %s641_s11, %s875_s11   ;;  %s597_s10 = sphi %s639_s10, %s874_s10   ;;  %s593_s9 = sphi %s637_s9, %s873_s9  }
   0x8   : > { %p53_p0 = scmp.ne.s32.totalorder %s597_s10, %s593_s9  ;;  %p671_p1 = scmp.eq.s32.totalorder %s361_s15, 0 }
   0x9   : > { %p675_p2 = scmp.eq.s32.totalorder %s361_s15, 1  ;;  %p106_p3 = scmp.eq.s32.totalorder %s362_s16, 1 }
   0xa   : > { %s858_s17 = scalar_select %p671_p1, 1, 0 }
   0xb   : > { %s859_s18 = scalar_select %p675_p2, 1, 0 }
   0xc   : > { %p681_p4 = por %p671_p1, %p53_p0  ;;  %p363_p5 = scmp.ge.s32.totalorder %s613_s14, 1 }
   0xd   : > { %p686_p6 = por %p106_p3, %p53_p0  ;;  %p113_p7 = scmp.lt.s32.totalorder %s613_s14, 3 }
   0xe   : > { %s860_s19 = scalar_select %p681_p4, 1, 0 }
   0xf   : > { %s861_s20 = scalar_select %p686_p6, 1, 0 }
  0x10   : > { %p691_p8 = pnand %p363_p5, %p113_p7  ;;  %s615_s22 = smov [#allocation5]  }
  0x11   : > { %s125_s23 = sshll.u32 %s615_s22, 4  ;;  %s31_s25 = sadd.s32 1, %s609_s13  ;;  %s126_s23 = int_to_ptr.vmem [resolvable:$true] %s125_s23 }
  0x12   : > { %s862_s21 = scalar_select %p691_p8, 1, 0 }
  0x13   : > { %p398_p9 = pneg %p691_p8  ;;  %s469_s28 = scalar_lea.hbm %s852_s1, 256 }
  0x14   : > { %p470_p12 = scmp.ne.s32.totalorder %s852_s1, %s469_s28  ;;  %p476_p5 = scmp.lt.u32.totalorder %s469_s28, %s852_s1 }
  0x15   : > { %p700_p11 = pnand %p398_p9, %p671_p1 }
  0x17   : > { %p471_p13 = pneg %p700_p11 }
  0x19   : > { %p472_p0 = pnand %p471_p13, %p470_p12 }
  0x1b   : > { %p473_p3 = pneg %p472_p0 }
  0x1d   : > { %p478_p7 = pnand %p476_p5, %p473_p3 }
  0x1f   : > { %481 = shalt.err (!%p478_p7)
}
  0x20   : > { %s482_s5 = scalar_lea.vmem %s126_s23, 256  ;;  %p490_p1 = scmp.lt.s32.totalorder %s126_s23, %s126_s23 }
  0x21   : > { %p483_p9 = scmp.ne.s32.totalorder %s126_s23, %s482_s5  ;;  %p491_p4 = scmp.lt.s32.totalorder %s482_s5, %s482_s5 }
  0x23   : > { %p485_p10 = pnand %p483_p9, %p471_p13  ;;  %p492_p8 = por %p491_p4, %p490_p1 }
  0x25   : > { %p486_p6 = pneg %p485_p10 }
  0x27   : > { %p493_p2 = pnand %p492_p8, %p486_p6 }
  0x29   : > { %496 = shalt.err (!%p493_p2)
}
  0x2a   : > { %s616_s6 = smov 64   ;;  %s617_s7 = smov 4  }
  0x2b   : > { %401 = dma.hbm_to_vmem [thread:$0]  (!%p700_p11), %s852_s1, 256, %s126_s23, [#allocation6], %s616_s6, %s616_s6, %s617_s7  }
  0x2c   : > { %p33_p1 = scmp.ge.s32.totalorder %s31_s25, 2  ;;  %s40_s16 = sadd.s32 1, %s601_s11 }
  0x2d   : > { %p47_p2 = scmp.ne.s32.totalorder %s601_s11, %s597_s10  ;;  %p48_p4 = scmp.eq.s32.totalorder %s613_s14, 0 }
  0x2e   : > { %s879_s25 = smov (%p33_p1, %s31_s25), 0  ;;  %p865_p8 = scmp.ne.s32.totalorder %s859_s18, 0 }
  0x2f   : > { %p727_p6 = por %p48_p4, %p47_p2  ;;  %s35_s24 = ssub.s32 %s609_s13, %s879_s25 }
  0x30   : > { %p733_p10 = por %p865_p8, %p47_p2  ;;  %p411_p12 = scmp.lt.s32.totalorder %s613_s14, 2 }
  0x31   : > { %p38_p11 = scmp.eq.s32.totalorder %s35_s24, 0  ;;  %s139_s23 = sand.u32 1, %s601_s11  }
  0x32   : > { %s366_s27 = sshll.u32 %s139_s23, 2  ;;  %s367_s29 = sshll.u32 %s609_s13, 6 }
  0x33   : > { %s742_s28 = scalar_select %p38_p11, %s601_s11, %s40_s16  }
  0x34   : > { %s748_s4 = scalar_lea.hbm %s851_s0, %s367_s29  ;;  %s143_s18 = scalar_lea.vmem [#allocation2], %s366_s27 }
  0x35   : > { %s151_s5 = sshll.u32 %s143_s18, 4  ;;  %p754_p13 = pnand %p411_p12, %p727_p6  ;;  %s750_s5 = int_to_ptr.vmem [resolvable:$true] %s151_s5 }
  0x36   : > { %s140_s7 = scalar_lea.sflag [#allocation3], %s139_s23  ;;  %s497_s8 = scalar_lea.hbm %s748_s4, 64 }
  0x37   : > { %p498_p0 = scmp.ne.s32.totalorder %s748_s4, %s497_s8  ;;  %p499_p3 = pneg %p754_p13 }
  0x38   : > { %s502_s24 = scalar_lea.hbm %s851_s0, 128  ;;  %p503_p9 = scmp.lt.u32.totalorder %s748_s4, %s851_s0 }
  0x39   : > { %p500_p5 = pnand %p499_p3, %p498_p0  ;;  %p504_p1 = scmp.lt.u32.totalorder %s502_s24, %s497_s8 }
  0x3a   : > { %p506_p4 = scmp.lt.u32.totalorder %s497_s8, %s748_s4 }
  0x3b   : > { %p501_p7 = pneg %p500_p5  ;;  %p505_p2 = por %p504_p1, %p503_p9 }
  0x3d   : > { %p507_p6 = por %p506_p4, %p505_p2 }
  0x3f   : > { %p508_p8 = pnand %p507_p6, %p501_p7 }
  0x41   : > { %511 = shalt.err (!%p508_p8)
}
  0x42   : > { %s512_s23 = scalar_lea.vmem %s750_s5, 64  ;;  %s618_s29 = smov [#allocation2]  }
  0x43   : > { %p513_p12 = scmp.ne.s32.totalorder %s750_s5, %s512_s23  ;;  %s517_s30 = sshll.u32 %s618_s29, 4  ;;  %s518_s30 = int_to_ptr.vmem [resolvable:$false] %s517_s30 }
  0x44   : > { %s519_s3 = scalar_lea.vmem %s518_s30, 128  ;;  %p520_p5 = scmp.lt.s32.totalorder %s750_s5, %s518_s30 }
  0x45   : > { %p515_p11 = pnand %p513_p12, %p499_p3  ;;  %p521_p9 = scmp.lt.s32.totalorder %s519_s3, %s512_s23 }
  0x47   : > { %p516_p0 = pneg %p515_p11  ;;  %p522_p1 = por %p521_p9, %p520_p5 }
  0x49   : > { %p523_p2 = pnand %p522_p1, %p516_p0 }
  0x4b   : > { %526 = shalt.err (!%p523_p2)
}
  0x4c   : > { %405 = dma.hbm_to_vmem [thread:$0]  (!%p754_p13), %s748_s4, 64, %s750_s5, %s140_s7  }
  0x4d   : > { %p868_p7 = scmp.ne.s32.totalorder %s862_s21, 0 }
  0x4e   : > { %s786_s18 = sand.u32 (!%p868_p7), 1, %s597_s10   ;;  %p869_p3 = scmp.ne.s32.totalorder (!%p868_p7), %s860_s19, 0 }
  0x4f   : > { %160 = sbr.rel (%p868_p7) target bundleno = 327 (0x147), region = 28  ;;  %s369_s8 = sshll.u32 (!%p868_p7), %s786_s18, 2 }
  0x50   : > { %s163_s15 = scalar_lea.sflag (!%p868_p7), [#allocation3], %s786_s18  ;;  %s166_s16 = scalar_lea.vmem (!%p868_p7), [#allocation2], %s369_s8 }
  0x56   : > { %580 = dma.done.wait (%p869_p3), %s163_s15, 64  }
  0x57   : > { %582 = vsyncadd (%p869_p3), %s163_s15, 4294967232  ;;  %p870_p4 = scmp.ne.s32.totalorder %s858_s17, 0 }
  0x59   : > { %584 = dma.done.wait (%p870_p4), [#allocation6], 256  }
  0x5a   : > { %586 = vsyncadd (%p870_p4), [#allocation6], 4294967040  ;;  %v619_v0 = vmov 0.0   ;;  %vm620_vm0 = vmmov 0   ;;  %v467_v1 = vld [vmem:[#allocation5] sm:$0xff]   ;;  %v468_v2 = vld [vmem:[#allocation5 + $0x8] sm:$0xff]  }
  0x5b   : > { %382 = vmatprep.subr.bf16.mxu0 %v619_v0  ;;  %386 = vmatprep.mubr.msk.bf16.mxu0 %vm620_vm0, %v619_v0  ;;  %v192_v3 = vld [vmem:[%s166_s16] sm:$0xf]  ;;  %vm209_vm1 = vcmask 261120   ;;  %s376_s19 = sshll.u32 %s605_s12, 6  ;;  %s190_s21 = scalar_lea.vmem [#allocation7], %s369_s8  ;;  %vm254_vm2 = vcmask 781312  }
  0x5c   : > { %383 = vmatpush3.bf16.msra.mxu0 %v467_v1  ;;  %s271_s4 = sshll.u32 %s190_s21, 4  ;;  %s802_s6 = scalar_lea.hbm %s853_s2, %s376_s19  ;;  %s804_s4 = int_to_ptr.vmem [resolvable:$true] %s271_s4 }
  0x5d   : > { %384 = vmatprep.subr.bf16.mxu0 %v619_v0  ;;  %s257_s12 = scalar_lea.sflag [#allocation4], %s786_s18  ;;  %s527_s7 = scalar_lea.vmem %s804_s4, 64 }
  0x5e   : > { %p528_p13 = scmp.ne.s32.totalorder %s804_s4, %s527_s7  ;;  %s621_s24 = smov [#allocation7]  }
  0x5f   : > { %s531_s22 = sshll.u32 %s621_s24, 4  ;;  %s532_s22 = int_to_ptr.vmem [resolvable:$false] %s531_s22 }
  0x60   : > { %385 = vmatpush3.bf16.msra.mxu0 %v468_v2  ;;  %p529_p6 = pnand %p528_p13, %p733_p10  ;;  %s533_s27 = scalar_lea.vmem %s532_s22, 128 }
  0x61   : > { %p534_p12 = scmp.lt.s32.totalorder %s804_s4, %s532_s22  ;;  %p535_p11 = scmp.lt.s32.totalorder %s533_s27, %s527_s7 }
  0x62   : > { %p530_p8 = pneg %p529_p6 }
  0x63   : > { %387 = vmatmul.mubr.msk.bf16.vlgmr.msra.gmra.mrb[0].mxu0 %vm209_vm1, %v192_v3  ;;  %p536_p0 = por %p535_p11, %p534_p12 }
  0x65   : > { %p537_p5 = pnand %p536_p0, %p530_p8 }
 0x136   : > { %v247_v4 = vpop.f32.mrb[0].mxu0 }
 0x137   : > { %v253_v5 = vpack.c.bf16 %v247_v4, %v247_v4  ;;  %v388_v6 = vpop.f32.mrb[1].mxu0 }
 0x138   : > { %v250_v7 = vpop.f32.mrb[2].mxu0 }
 0x139   : > { %v389_v8 = vpop.f32.mrb[3].mxu0  ;;  %255 = vst.msk [vmem:[%s190_s21] sm:$0xf] %vm254_vm2, %v253_v5 }
 0x13a   : > { %540 = shalt.err (!%p537_p5)
}
 0x13b   : > { %s541_s23 = scalar_lea.hbm %s802_s6, 64  ;;  %s545_s3 = scalar_lea.hbm %s853_s2, 128 }
 0x13c   : > { %p542_p9 = scmp.ne.s32.totalorder %s802_s6, %s541_s23  ;;  %p546_p7 = scmp.lt.u32.totalorder %s802_s6, %s853_s2 }
 0x13d   : > { %p547_p3 = scmp.lt.u32.totalorder %s545_s3, %s541_s23  ;;  %p549_p13 = scmp.lt.u32.totalorder %s541_s23, %s802_s6 }
 0x13e   : > { %p543_p1 = pnand %p542_p9, %p733_p10 }
 0x13f   : > { %p548_p4 = por %p547_p3, %p546_p7 }
 0x140   : > { %p544_p2 = pneg %p543_p1 }
 0x141   : > { %p550_p6 = por %p549_p13, %p548_p4 }
 0x143   : > { %p551_p8 = pnand %p550_p6, %p544_p2 }
 0x145   : > { %554 = shalt.err (!%p551_p8)
}
 0x146   : > { %396 = dma.vmem_to_hbm [thread:$0]  (%p733_p10), %s804_s4, 64, %s802_s6, %s257_s12  }
 0x147 PF: > { %s283_s15 = sand.u32 1, %s593_s9   ;;  %p871_p12 = scmp.ne.s32.totalorder %s861_s20, 0 }
 0x148   : > { %p872_p11 = scmp.ge.s32.totalorder %s613_s14, 2  ;;  %s284_s16 = scalar_lea.sflag [#allocation4], %s283_s15 }
 0x14a   : > { %p407_p0 = pnand %p872_p11, %p871_p12 }
 0x14c   : > { %588 = dma.done.wait (!%p407_p0), %s284_s16, 64  }
 0x14d   : > { %590 = vsyncadd (!%p407_p0), %s284_s16, 4294967232  ;;  %s19_s14 = sadd.s32 1, %s613_s14   ;;  %s873_s9 = smov %s597_s10 }
 0x14e   : > { %p16_p5 = scmp.ge.s32.totalorder %s19_s14, 4   ;;  %s874_s10 = smov %s601_s11 }
 0x14f   : > { %s875_s11 = smov %s742_s28  ;;  %s876_s12 = smov %s609_s13 }
 0x150   : > { %s877_s13 = smov %s879_s25  ;;  %18 = sbr.rel (!%p16_p5) target bundleno = 7 (0x7), region = 77 }
 0x157   :  { %289 = vsyncpa [#allocation3], 1 }
 0x158   :  { %291 = vsyncpa [#allocation3 + $0x1], 1 }
 0x159   :  { %292 = vsyncpa [#allocation6], 1 }
 0x15a   :  { %293 = vsyncpa [#allocation4], 1 }
 0x15b   :  { %295 = vsyncpa [#allocation4 + $0x1], 1 }

</bundles_post_ra>
